<compile_context>
chip_gen: v6e
topology: v6e:2x2x1
jax: 0.10.0
libtpu: 0.0.40
codegen_flags: <defaults>
</compile_context>

<pallas_src>
import math

import jax
import jax.numpy as jnp
from jax import lax
from jax.experimental import pallas as pl
from jax.experimental.pallas import tpu as pltpu


def _round_up(x, m):
    return ((x + m - 1) // m) * m


def _vmem_budget_bytes():
    """(budget for double-buffered pipeline blocks, compiler vmem limit)."""
    try:
        cap = int(pltpu.get_tpu_info().vmem_capacity_bytes)
    except Exception:
        cap = None
    if cap is None:
        return 16 * 2**20, 32 * 2**20
    if cap >= 100 * 2**20:
        # v5e / v6e: 128 MiB physical VMEM (v5e default scoped limit is only
        # 16 MiB, so the explicit vmem_limit_bytes below matters there).
        return 32 * 2**20, 64 * 2**20
    # v7x: 64 MiB per-TC VMEM. In-kernel temps are strip-mined to a few vregs,
    # so ~24 MiB of pipelined blocks under a 48 MiB scoped limit is safe.
    return 24 * 2**20, 48 * 2**20


def _choose_blocks(N, C, F, P, x_sz, p_sz, out_sz, budget):
    """Pick (tile_f, grid_f, n_blk, grid_n).

    n_blk is always a multiple of 8 (so the x block and the flat output block
    are sublane-aligned regardless of N), tile_f is a multiple of 128, and
    ragged last blocks are left to Pallas (no host padding, no post-slice).
    """
    tile_f = min(2048, _round_up(F, 128))
    while True:
        # 8 batch rows, double-buffered in/out blocks.
        per_grp = 2 * 8 * tile_f * (x_sz + C * out_sz)
        # a/b double-buffers + slack for strip-mined in-kernel temporaries.
        fixed = 2 * 2 * P * tile_f * p_sz + (1 << 20)
        if fixed + per_grp <= budget or tile_f <= 128:
            break
        tile_f -= 128
    grid_f = pl.cdiv(F, tile_f)
    n_blk_max = 8 * max(1, (budget - fixed) // per_grp)

    # >=2 batch steps (v7x two-TC split) and >=8 total steps when N allows.
    want_n = max(2, pl.cdiv(8, grid_f))
    n_blk = _round_up(max(1, pl.cdiv(N, want_n)), 8)
    n_blk = max(8, min(n_blk, n_blk_max))
    grid_n = pl.cdiv(N, n_blk)

    # If the whole problem still collapsed to one grid step, split the feature
    # axis so there is pipeline overlap and both v7x TensorCores get work.
    if grid_f * grid_n == 1 and tile_f > 128:
        tile_f = max(128, _round_up(tile_f // 2, 128))
        grid_f = pl.cdiv(F, tile_f)

    return tile_f, grid_f, n_blk, grid_n


def _make_rot_kernel(C, P, reps, n_blk, tile_f):
    """Kernel over one (n_blk, tile_f) x-block -> (n_blk*C, tile_f) out-block."""
    n_chunks = (n_blk * C) // P          # exact: 8 | n_blk  =>  P | n_blk*C

    def kernel(x_ref, a_ref, b_ref, o_ref):
        # x_ref : (n_blk, TF)
        # a_ref, b_ref : (P, TF), row r == param[r % C]  (host-tiled pattern)
        # o_ref : (n_blk*C, TF) flat rows, row = batch*C + class
        def chunk(i, carry):
            a = a_ref[...]
            b = b_ref[...]
            base = i * reps                              # first batch row of chunk
            if C == 1:
                x_rep = x_ref[pl.ds(pl.multiple_of(base, 8), P), :]
            elif reps == 1:                              # C % 8 == 0
                x_rep = jnp.broadcast_to(x_ref[pl.ds(base, 1), :], (P, tile_f))
            else:
                parts = [
                    jnp.broadcast_to(x_ref[pl.ds(base + j, 1), :], (C, tile_f))
                    for j in range(reps)
                ]
                x_rep = jnp.concatenate(parts, axis=0)   # (P, TF)
            out = (a * (x_rep + b)).astype(o_ref.dtype)
            # Dense, 8-aligned full-sublane store (1 vst per output vreg).
            o_ref[pl.ds(pl.multiple_of(i * P, 8), P), :] = out
            return carry

        lax.fori_loop(0, n_chunks, chunk, 0, unroll=min(n_chunks, 4))

    return kernel


def rot_forward(points, a, b):
    """Pallas implementation of RoT.forward / RoT.importance."""
    N = points.shape[0]
    sample_shape = points.shape[1:]
    C = a.shape[0]
    assert a.shape[1:] == sample_shape and b.shape == a.shape
    F = int(math.prod(sample_shape)) if sample_shape else 1

    # PyTorch-style dtype promotion (do not silently downcast params).
    out_dtype = jnp.result_type(points.dtype, a.dtype, b.dtype)
    x_sz = jnp.dtype(points.dtype).itemsize
    p_sz = max(jnp.dtype(a.dtype).itemsize, jnp.dtype(b.dtype).itemsize)
    out_sz = jnp.dtype(out_dtype).itemsize

    # Sublane-periodic class pattern: chunks of P = lcm(C, 8) flat output rows
    # start on 8-row boundaries and always cover whole batch rows.
    P = (C * 8) // math.gcd(C, 8)
    reps = P // C                        # batch rows per chunk

    budget, vmem_limit = _vmem_budget_bytes()
    tile_f, grid_f, n_blk, grid_n = _choose_blocks(
        N, C, F, P, x_sz, p_sz, out_sz, budget)

    x2 = points.reshape(N, F)
    a2 = a.reshape(C, F)
    b2 = b.reshape(C, F)
    if P != C:
        # Tiny (P, F) periodic copies of the (C, F) parameters (a2[r] == a[r%C]);
        # O(P*F) bytes — NOT an extra pass over x or the output.
        a2 = jnp.tile(a2, (reps, 1))
        b2 = jnp.tile(b2, (reps, 1))

    kernel = _make_rot_kernel(C, P, reps, n_blk, tile_f)

    cost = pl.CostEstimate(
        flops=2 * N * C * F,
        transcendentals=0,
        bytes_accessed=N * F * x_sz + 2 * P * F * p_sz + N * C * F * out_sz,
    )

    out2 = pl.pallas_call(
        kernel,
        out_shape=jax.ShapeDtypeStruct((N * C, F), out_dtype),
        grid_spec=pltpu.PrefetchScalarGridSpec(
            num_scalar_prefetch=0,
            grid=(grid_f, grid_n),            # batch innermost: a/b not re-DMA'd
            in_specs=[
                pl.BlockSpec((n_blk, tile_f), lambda f, n: (n, f)),
                pl.BlockSpec((P, tile_f), lambda f, n: (0, f)),
                pl.BlockSpec((P, tile_f), lambda f, n: (0, f)),
            ],
            out_specs=pl.BlockSpec((n_blk * C, tile_f), lambda f, n: (n, f)),
        ),
        compiler_params=pltpu.CompilerParams(
            dimension_semantics=("parallel", "parallel"),
            vmem_limit_bytes=vmem_limit,
        ),
        cost_estimate=cost,
    )(x2, a2, b2)

    # Free, contiguous metadata reshape — no padded copy, no slice.
    return out2.reshape((N, C) + sample_shape)


if __name__ == "__main__":
    def _check(batch, classes, sample_shape, key):
        kx, ka, kb = jax.random.split(key, 3)
        # The module zero-inits a and b (output would be all zeros); use random
        # values so the kernel compute is actually exercised.
        x = jax.random.normal(kx, (batch,) + sample_shape, dtype=jnp.float32)
        a = jax.random.normal(ka, (classes,) + sample_shape, dtype=jnp.float32)
        b = jax.random.normal(kb, (classes,) + sample_shape, dtype=jnp.float32)
        out = jax.block_until_ready(rot_forward(x, a, b))
        ref = a[None] * (x[:, None] + b[None])
        assert out.shape == (batch, classes) + sample_shape
        assert out.dtype == ref.dtype
        err = float(jnp.max(jnp.abs(out - ref)))
        assert jnp.allclose(out, ref, atol=1e-6, rtol=1e-6), err

    key = jax.random.PRNGKey(0)
    k1, k2 = jax.random.split(key)
    # Shapes consistent with the module: classes=4, sample_shape=(4,16,16), batch=2.
    _check(2, 4, (4, 16, 16), k1)
    # Unaligned batch / feature count: exercises the ragged (clipped) blocks
    # that replace the old host-side pad + post-kernel slice.
    _check(3, 4, (5, 7), k2)
    # TODO(synk): self.g and the training-side methods (loss / pretrain_loss /
    # fit / SWA / stochastic_importance dropout) are not part of forward() and
    # are intentionally not implemented here.
    print("KERNEL_OK")
</pallas_src>

<mosaic_0001>
module attributes {stable_mosaic.version = 11 : i64} {
  func.func @kernel(%arg0: i32, %arg1: i32, %arg2: memref<8x512xf32, #tpu.memory_space<vmem>>, %arg3: memref<8x512xf32, #tpu.memory_space<vmem>>, %arg4: memref<8x512xf32, #tpu.memory_space<vmem>>, %arg5: memref<32x512xf32, #tpu.memory_space<vmem>>) attributes {dimension_semantics = [#tpu.dimension_semantics<parallel>, #tpu.dimension_semantics<parallel>], iteration_bounds = array<i64: 2, 1>, scalar_prefetch = 0 : i64, scratch_operands = 0 : i64, tpu.core_type = #tpu.core_type<tc>, window_params = [{transform_indices = @transform_0, window_bounds = array<i64: 8, 512>}, {transform_indices = @transform_1, window_bounds = array<i64: 8, 512>}, {transform_indices = @transform_2, window_bounds = array<i64: 8, 512>}, {transform_indices = @transform_3, window_bounds = array<i64: 32, 512>}]} {
    %c0_i32 = arith.constant 0 : i32
    %c0 = arith.constant 0 : index
    %c0_0 = arith.constant 0 : index
    %0 = vector.load %arg3[%c0, %c0_0] : memref<8x512xf32, #tpu.memory_space<vmem>>, vector<8x512xf32>
    %c0_1 = arith.constant 0 : index
    %c0_2 = arith.constant 0 : index
    %1 = vector.load %arg4[%c0_1, %c0_2] : memref<8x512xf32, #tpu.memory_space<vmem>>, vector<8x512xf32>
    %c2_i32 = arith.constant 2 : i32
    %2 = arith.muli %c0_i32, %c2_i32 : i32
    %c0_i32_3 = arith.constant 0 : i32
    %3 = arith.addi %2, %c0_i32_3 : i32
    %4 = arith.index_cast %3 : i32 to index
    %c0_4 = arith.constant 0 : index
    %5 = vector.load %arg2[%4, %c0_4] : memref<8x512xf32, #tpu.memory_space<vmem>>, vector<1x512xf32>
    %6 = vector.shape_cast %5 : vector<1x512xf32> to vector<1x512xf32>
    %7 = vector.broadcast %6 : vector<1x512xf32> to vector<4x512xf32>
    %c1_i32 = arith.constant 1 : i32
    %8 = arith.addi %2, %c1_i32 : i32
    %9 = arith.index_cast %8 : i32 to index
    %c0_5 = arith.constant 0 : index
    %10 = vector.load %arg2[%9, %c0_5] : memref<8x512xf32, #tpu.memory_space<vmem>>, vector<1x512xf32>
    %11 = vector.shape_cast %10 : vector<1x512xf32> to vector<1x512xf32>
    %12 = vector.broadcast %11 : vector<1x512xf32> to vector<4x512xf32>
    %13 = tpu.concatenate %7, %12 in 0 : vector<4x512xf32>, vector<4x512xf32> -> vector<8x512xf32>
    %14 = arith.addf %13, %1 : vector<8x512xf32>
    %15 = arith.mulf %0, %14 : vector<8x512xf32>
    %c8_i32 = arith.constant 8 : i32
    %16 = arith.muli %c0_i32, %c8_i32 : i32
    %17 = tpu.assume_multiple %16, 8 : i32
    %18 = arith.index_cast %17 : i32 to index
    %c0_6 = arith.constant 0 : index
    %19 = vector.load %arg5[%18, %c0_6] : memref<32x512xf32, #tpu.memory_space<vmem>>, vector<8x512xf32>
    tpu.vector_store %arg5[%18, %c0_6], %15 {strides = array<i32>} : memref<32x512xf32, #tpu.memory_space<vmem>>, vector<8x512xf32>,
    %c1_i32_7 = arith.constant 1 : i32
    %c0_8 = arith.constant 0 : index
    %c0_9 = arith.constant 0 : index
    %20 = vector.load %arg3[%c0_8, %c0_9] : memref<8x512xf32, #tpu.memory_space<vmem>>, vector<8x512xf32>
    %c0_10 = arith.constant 0 : index
    %c0_11 = arith.constant 0 : index
    %21 = vector.load %arg4[%c0_10, %c0_11] : memref<8x512xf32, #tpu.memory_space<vmem>>, vector<8x512xf32>
    %c2_i32_12 = arith.constant 2 : i32
    %22 = arith.muli %c1_i32_7, %c2_i32_12 : i32
    %c0_i32_13 = arith.constant 0 : i32
    %23 = arith.addi %22, %c0_i32_13 : i32
    %24 = arith.index_cast %23 : i32 to index
    %c0_14 = arith.constant 0 : index
    %25 = vector.load %arg2[%24, %c0_14] : memref<8x512xf32, #tpu.memory_space<vmem>>, vector<1x512xf32>
    %26 = vector.shape_cast %25 : vector<1x512xf32> to vector<1x512xf32>
    %27 = vector.broadcast %26 : vector<1x512xf32> to vector<4x512xf32>
    %c1_i32_15 = arith.constant 1 : i32
    %28 = arith.addi %22, %c1_i32_15 : i32
    %29 = arith.index_cast %28 : i32 to index
    %c0_16 = arith.constant 0 : index
    %30 = vector.load %arg2[%29, %c0_16] : memref<8x512xf32, #tpu.memory_space<vmem>>, vector<1x512xf32>
    %31 = vector.shape_cast %30 : vector<1x512xf32> to vector<1x512xf32>
    %32 = vector.broadcast %31 : vector<1x512xf32> to vector<4x512xf32>
    %33 = tpu.concatenate %27, %32 in 0 : vector<4x512xf32>, vector<4x512xf32> -> vector<8x512xf32>
    %34 = arith.addf %33, %21 : vector<8x512xf32>
    %35 = arith.mulf %20, %34 : vector<8x512xf32>
    %c8_i32_17 = arith.constant 8 : i32
    %36 = arith.muli %c1_i32_7, %c8_i32_17 : i32
    %37 = tpu.assume_multiple %36, 8 : i32
    %38 = arith.index_cast %37 : i32 to index
    %c0_18 = arith.constant 0 : index
    %39 = vector.load %arg5[%38, %c0_18] : memref<32x512xf32, #tpu.memory_space<vmem>>, vector<8x512xf32>
    tpu.vector_store %arg5[%38, %c0_18], %35 {strides = array<i32>} : memref<32x512xf32, #tpu.memory_space<vmem>>, vector<8x512xf32>,
    %c2_i32_19 = arith.constant 2 : i32
    %c0_20 = arith.constant 0 : index
    %c0_21 = arith.constant 0 : index
    %40 = vector.load %arg3[%c0_20, %c0_21] : memref<8x512xf32, #tpu.memory_space<vmem>>, vector<8x512xf32>
    %c0_22 = arith.constant 0 : index
    %c0_23 = arith.constant 0 : index
    %41 = vector.load %arg4[%c0_22, %c0_23] : memref<8x512xf32, #tpu.memory_space<vmem>>, vector<8x512xf32>
    %c2_i32_24 = arith.constant 2 : i32
    %42 = arith.muli %c2_i32_19, %c2_i32_24 : i32
    %c0_i32_25 = arith.constant 0 : i32
    %43 = arith.addi %42, %c0_i32_25 : i32
    %44 = arith.index_cast %43 : i32 to index
    %c0_26 = arith.constant 0 : index
    %45 = vector.load %arg2[%44, %c0_26] : memref<8x512xf32, #tpu.memory_space<vmem>>, vector<1x512xf32>
    %46 = vector.shape_cast %45 : vector<1x512xf32> to vector<1x512xf32>
    %47 = vector.broadcast %46 : vector<1x512xf32> to vector<4x512xf32>
    %c1_i32_27 = arith.constant 1 : i32
    %48 = arith.addi %42, %c1_i32_27 : i32
    %49 = arith.index_cast %48 : i32 to index
    %c0_28 = arith.constant 0 : index
    %50 = vector.load %arg2[%49, %c0_28] : memref<8x512xf32, #tpu.memory_space<vmem>>, vector<1x512xf32>
    %51 = vector.shape_cast %50 : vector<1x512xf32> to vector<1x512xf32>
    %52 = vector.broadcast %51 : vector<1x512xf32> to vector<4x512xf32>
    %53 = tpu.concatenate %47, %52 in 0 : vector<4x512xf32>, vector<4x512xf32> -> vector<8x512xf32>
    %54 = arith.addf %53, %41 : vector<8x512xf32>
    %55 = arith.mulf %40, %54 : vector<8x512xf32>
    %c8_i32_29 = arith.constant 8 : i32
    %56 = arith.muli %c2_i32_19, %c8_i32_29 : i32
    %57 = tpu.assume_multiple %56, 8 : i32
    %58 = arith.index_cast %57 : i32 to index
    %c0_30 = arith.constant 0 : index
    %59 = vector.load %arg5[%58, %c0_30] : memref<32x512xf32, #tpu.memory_space<vmem>>, vector<8x512xf32>
    tpu.vector_store %arg5[%58, %c0_30], %55 {strides = array<i32>} : memref<32x512xf32, #tpu.memory_space<vmem>>, vector<8x512xf32>,
    %c3_i32 = arith.constant 3 : i32
    %c0_31 = arith.constant 0 : index
    %c0_32 = arith.constant 0 : index
    %60 = vector.load %arg3[%c0_31, %c0_32] : memref<8x512xf32, #tpu.memory_space<vmem>>, vector<8x512xf32>
    %c0_33 = arith.constant 0 : index
    %c0_34 = arith.constant 0 : index
    %61 = vector.load %arg4[%c0_33, %c0_34] : memref<8x512xf32, #tpu.memory_space<vmem>>, vector<8x512xf32>
    %c2_i32_35 = arith.constant 2 : i32
    %62 = arith.muli %c3_i32, %c2_i32_35 : i32
    %c0_i32_36 = arith.constant 0 : i32
    %63 = arith.addi %62, %c0_i32_36 : i32
    %64 = arith.index_cast %63 : i32 to index
    %c0_37 = arith.constant 0 : index
    %65 = vector.load %arg2[%64, %c0_37] : memref<8x512xf32, #tpu.memory_space<vmem>>, vector<1x512xf32>
    %66 = vector.shape_cast %65 : vector<1x512xf32> to vector<1x512xf32>
    %67 = vector.broadcast %66 : vector<1x512xf32> to vector<4x512xf32>
    %c1_i32_38 = arith.constant 1 : i32
    %68 = arith.addi %62, %c1_i32_38 : i32
    %69 = arith.index_cast %68 : i32 to index
    %c0_39 = arith.constant 0 : index
    %70 = vector.load %arg2[%69, %c0_39] : memref<8x512xf32, #tpu.memory_space<vmem>>, vector<1x512xf32>
    %71 = vector.shape_cast %70 : vector<1x512xf32> to vector<1x512xf32>
    %72 = vector.broadcast %71 : vector<1x512xf32> to vector<4x512xf32>
    %73 = tpu.concatenate %67, %72 in 0 : vector<4x512xf32>, vector<4x512xf32> -> vector<8x512xf32>
    %74 = arith.addf %73, %61 : vector<8x512xf32>
    %75 = arith.mulf %60, %74 : vector<8x512xf32>
    %c8_i32_40 = arith.constant 8 : i32
    %76 = arith.muli %c3_i32, %c8_i32_40 : i32
    %77 = tpu.assume_multiple %76, 8 : i32
    %78 = arith.index_cast %77 : i32 to index
    %c0_41 = arith.constant 0 : index
    %79 = vector.load %arg5[%78, %c0_41] : memref<32x512xf32, #tpu.memory_space<vmem>>, vector<8x512xf32>
    tpu.vector_store %arg5[%78, %c0_41], %75 {strides = array<i32>} : memref<32x512xf32, #tpu.memory_space<vmem>>, vector<8x512xf32>,
    %c4_i32 = arith.constant 4 : i32
    return
  }
  func.func @transform_0(%arg0: i32, %arg1: i32) -> (i32, i32) {
    %c0_i32 = arith.constant 0 : i32
    return %arg1, %arg0 : i32, i32
  }
  func.func @transform_1(%arg0: i32, %arg1: i32) -> (i32, i32) {
    %c0_i32 = arith.constant 0 : i32
    %c0_i32_0 = arith.constant 0 : i32
    return %c0_i32, %arg0 : i32, i32
  }
  func.func @transform_2(%arg0: i32, %arg1: i32) -> (i32, i32) {
    %c0_i32 = arith.constant 0 : i32
    %c0_i32_0 = arith.constant 0 : i32
    return %c0_i32, %arg0 : i32, i32
  }
  func.func @transform_3(%arg0: i32, %arg1: i32) -> (i32, i32) {
    %c0_i32 = arith.constant 0 : i32
    return %arg1, %arg0 : i32, i32
  }
}

</mosaic_0001>

<bundles_post_ra>
// kernel: tpu_custom_call.1
= control target key start
LH: loop header
LB: loop body
LE: loop exit
PB: predicated region body
PF: predicated region fallthrough
CT: control target
= control target key end

     0   :  { %s1335_s0 = inlined_call_operand.hbm [shape: f32[2,1024], index: 0, kind: input, shape index: {}]   ;;  %s1336_s1 = inlined_call_operand.hbm [shape: f32[8,1024], index: 1, kind: input, shape index: {}]   ;;  %s1337_s2 = inlined_call_operand.hbm [shape: f32[8,1024], index: 2, kind: input, shape index: {}]   ;;  %s1338_s3 = inlined_call_operand.hbm [shape: f32[8,1024], index: 3, kind: output, shape index: {}]  }
   0x1   :  { %1340 = sst [smem:[#allocation14_spill]] %s1335_s0 }
   0x2   :  { %8 = vsyncpa [#allocation3], 0 }
   0x3   :  { %10 = vsyncpa [#allocation3 + $0x1], 0 }
   0x4   :  { %11 = vsyncpa [#allocation6], 0 }
   0x5   :  { %13 = vsyncpa [#allocation6 + $0x1], 0 }
   0x6   :  { %14 = vsyncpa [#allocation4], 0 }
   0x7   :  { %16 = vsyncpa [#allocation4 + $0x1], 0  ;;  %s1042_s12 = smov 0   ;;  %s1044_s13 = smov 0  }
   0x8   :  { %s1046_s14 = smov 0   ;;  %s1048_s15 = smov 0  }
   0x9   :  { %s1050_s16 = smov 0   ;;  %s1052_s17 = smov 0  }
   0xa LB: > { %s1073_s18 = sadd.s32 4294967295, %s1010_s17   ;;  %s746_s19 = sadd.s32 4294967294, %s1010_s17   ;;  %s1010_s17 = sphi %s1052_s17, %s22_s17   ;;  %s1006_s16 = sphi %s1050_s16, %s1354_s16   ;;  %s1002_s15 = sphi %s1048_s15, %s1353_s15   ;;  %s998_s14 = sphi %s1046_s14, %s1352_s14   ;;  %s994_s13 = sphi %s1044_s13, %s1351_s13   ;;  %s990_s12 = sphi %s1042_s12, %s1350_s12  }
   0xb   : > { %s34_s20 = sadd.s32 1, %s1006_s16  ;;  %s43_s21 = sadd.s32 1, %s998_s14 }
   0xc   : > { %p36_p0 = scmp.ge.s32.totalorder %s34_s20, 2  ;;  %p50_p1 = scmp.ne.s32.totalorder %s998_s14, %s994_s13 }
   0xd   : > { %p51_p2 = scmp.eq.s32.totalorder %s1010_s17, 0  ;;  %p56_p3 = scmp.ne.s32.totalorder %s994_s13, %s990_s12 }
   0xe   : > { %s1356_s20 = smov (%p36_p0, %s34_s20), 0  ;;  %p57_p5 = scmp.eq.s32.totalorder %s1073_s18, 0 }
   0xf   : > { %1341 = sst [smem:[#allocation12_spill]] %s1356_s20  ;;  %p1085_p4 = por %p51_p2, %p50_p1 }
  0x10   : > { %s39_s23 = ssub.s32 %s1006_s16, %s1356_s20  ;;  %p134_p6 = scmp.eq.s32.totalorder %s1073_s18, 1 }
  0x11   : > { %p41_p7 = scmp.eq.s32.totalorder %s39_s23, 0  ;;  %p1093_p8 = por %p57_p5, %p56_p3 }
  0x12   : > { %p1097_p9 = por %p134_p6, %p50_p1  ;;  %p140_p10 = scmp.eq.s32.totalorder %s746_s19, 1 }
  0x13   : > { %s1102_s26 = scalar_select %p41_p7, %s998_s14, %s43_s21  }
  0x14   : > { %p1104_p11 = por %p140_p10, %p56_p3  ;;  %p748_p12 = scmp.ge.s32.totalorder %s1010_s17, 2 }
  0x15   : > { %1345 = sst [smem:[#allocation13_spill]] %s1102_s26 }
  0x16   : > { %156 = sbr.rel (%p748_p12) target bundleno = 75 (0x4b), region = 16 }
  0x1b   : > { %159 = sbr.rel (!%p1085_p4) target bundleno = 47 (0x2f), region = 20  ;;  %s160_s28 = sand.u32 (%p1085_p4), 1, %s998_s14  }
  0x1c   : > { %s749_s29 = sshll.u32 (%p1085_p4), %s160_s28, 5  ;;  %s161_s30 = scalar_lea.sflag (%p1085_p4), [#allocation3], %s160_s28 }
  0x1d   : > { %s164_s4 = scalar_lea.vmem (%p1085_p4), [#allocation2], %s749_s29 }
  0x20   : > { %172 = vsyncadd %s161_s30, 384  ;;  %s787_s5 = sshll.u32 %s1006_s16, 7  ;;  %s179_s6 = sshll.u32 %s164_s4, 4  ;;  %s180_s6 = int_to_ptr.vmem [resolvable:$true] %s179_s6 }
  0x21   : > { %s1347_s0 = sld [smem:[#allocation14_spill]]  ;;  %s866_s10 = scalar_lea.vmem %s180_s6, 128 }
  0x22   : > { %p867_p13 = scmp.ne.s32.totalorder %s180_s6, %s866_s10  ;;  %s1012_s11 = smov [#allocation2]  }
  0x23   : > { %s868_s19 = sshll.u32 %s1012_s11, 4  ;;  %s869_s19 = int_to_ptr.vmem [resolvable:$false] %s868_s19 }
  0x24   : > { %s870_s21 = scalar_lea.vmem %s869_s19, 1024  ;;  %p871_p0 = scmp.lt.s32.totalorder %s180_s6, %s869_s19 }
  0x25   : > { %p872_p1 = scmp.lt.s32.totalorder %s870_s21, %s866_s10 }
  0x27   : > { %s177_s9 = scalar_lea.hbm %s1347_s0, %s787_s5  ;;  %p873_p2 = por %p872_p1, %p871_p0 }
  0x29   : > { %p874_p3 = pnand %p873_p2, %p867_p13 }
  0x2b   : > { %877 = shalt.err (!%p874_p3)
}
  0x2c   : > { %s1013_s23 = smov 256   ;;  %s1014_s28 = smov 128  }
  0x2d   : > { %s1015_s29 = smov 8  }
  0x2e   : > { %185 = dma.hbm_to_vmem [thread:$0]  %s177_s9, 128, %s180_s6, %s161_s30, %s1013_s23, %s1014_s28, %s1015_s29  }
  0x2f PF: > { %s189_s4 = sand.u32 1, %s1010_s17   ;;  %s191_s5 = sand.u32 1, %s998_s14  }
  0x30   : > { %s752_s7 = sshll.u32 %s191_s5, 5  ;;  %s788_s8 = sshll.u32 %s1006_s16, 9 }
  0x31   : > { %s199_s10 = scalar_lea.hbm %s1336_s1, %s788_s8  ;;  %s193_s19 = scalar_lea.vmem [#allocation5], %s752_s7 }
  0x32   : > { %s201_s21 = sshll.u32 %s193_s19, 4  ;;  %s1124_s20 = scalar_lea.sflag [#allocation6], %s189_s4  ;;  %s202_s21 = int_to_ptr.vmem [resolvable:$true] %s201_s21 }
  0x33   : > { %s890_s26 = scalar_lea.vmem %s202_s21, 512  ;;  %s1016_s30 = smov [#allocation5]  }
  0x34   : > { %p891_p5 = scmp.ne.s32.totalorder %s202_s21, %s890_s26  ;;  %s894_s6 = sshll.u32 %s1016_s30, 4  ;;  %s895_s6 = int_to_ptr.vmem [resolvable:$false] %s894_s6 }
  0x35   : > { %s896_s9 = scalar_lea.vmem %s895_s6, 1024  ;;  %p897_p10 = scmp.lt.s32.totalorder %s202_s21, %s895_s6 }
  0x36   : > { %p892_p6 = pnand %p891_p5, %p1085_p4  ;;  %p898_p13 = scmp.lt.s32.totalorder %s896_s9, %s890_s26 }
  0x38   : > { %p893_p7 = pneg %p892_p6  ;;  %p899_p0 = por %p898_p13, %p897_p10 }
  0x3a   : > { %p900_p1 = pnand %p899_p0, %p893_p7 }
  0x3c   : > { %903 = shalt.err (!%p900_p1)
}
  0x3d   : > { %791 = dma.hbm_to_vmem [thread:$0]  (%p1085_p4), %s199_s10, 512, %s202_s21, %s1124_s20  }
  0x3e   : > { %s218_s28 = scalar_lea.hbm %s1337_s2, %s788_s8  ;;  %s212_s29 = scalar_lea.vmem [#allocation7], %s752_s7 }
  0x3f   : > { %s220_s4 = sshll.u32 %s212_s29, 4  ;;  %s1017_s26 = smov [#allocation7]   ;;  %s221_s4 = int_to_ptr.vmem [resolvable:$true] %s220_s4 }
  0x40   : > { %s916_s5 = scalar_lea.vmem %s221_s4, 512  ;;  %s920_s11 = sshll.u32 %s1017_s26, 4  ;;  %s921_s11 = int_to_ptr.vmem [resolvable:$false] %s920_s11 }
  0x41   : > { %p917_p2 = scmp.ne.s32.totalorder %s221_s4, %s916_s5  ;;  %s922_s19 = scalar_lea.vmem %s921_s11, 1024 }
  0x42   : > { %p923_p6 = scmp.lt.s32.totalorder %s221_s4, %s921_s11  ;;  %p924_p7 = scmp.lt.s32.totalorder %s922_s19, %s916_s5 }
  0x43   : > { %p918_p3 = pnand %p917_p2, %p1085_p4 }
  0x44   : > { %p925_p10 = por %p924_p7, %p923_p6 }
  0x45   : > { %p919_p5 = pneg %p918_p3 }
  0x47   : > { %p926_p13 = pnand %p925_p10, %p919_p5 }
  0x49   : > { %929 = shalt.err (!%p926_p13)
}
  0x4a   : > { %792 = dma.hbm_to_vmem [thread:$0]  (%p1085_p4), %s218_s28, 512, %s221_s4, %s1124_s20  }
  0x4b PF: > { %p758_p0 = scmp.ge.s32.totalorder %s1010_s17, 1  ;;  %p225_p1 = scmp.lt.s32.totalorder %s1010_s17, 3 }
  0x4d   : > { %p226_p2 = pnand %p758_p0, %p225_p1 }
  0x4e   : > { %s1142_s7 = sand.u32 (!%p226_p2), 1, %s994_s13  }
  0x4f   : > { %229 = sbr.rel (%p226_p2) target bundleno = 144 (0x90), region = 32  ;;  %s759_s8 = sshll.u32 (!%p226_p2), %s1142_s7, 5 }
  0x50   : > { %s232_s10 = scalar_lea.sflag (!%p226_p2), [#allocation3], %s1142_s7  ;;  %s1146_s21 = scalar_lea.vmem (!%p226_p2), [#allocation2], %s759_s8 }
  0x54   : > { %977 = dma.done.wait (%p1093_p8), %s232_s10, 512  }
  0x55   : > { %979 = vsyncadd (%p1093_p8), %s232_s10, 4294966784  ;;  %s240_s20 = sand.u32 1, %s1073_s18   ;;  %s1153_s30 = scalar_lea.vmem [#allocation5], %s759_s8 }
  0x56   : > { %s241_s22 = scalar_lea.sflag [#allocation6], %s240_s20 }
  0x57   : > { %981 = dma.done.wait (%p1093_p8), %s241_s22, 1024  }
  0x58   : > { %983 = vsyncadd (%p1093_p8), %s241_s22, 4294966272  ;;  %v308_v0 = vlaneseq  ;;  %v306_v6 = vld [vmem:[%s1146_s21] ss:$2 sm:$0xf]  ;;  %vm351_vm0 = vcmask 1043456   ;;  %s253_s18 = scalar_lea.vmem [#allocation7], %s759_s8 }
  0x59   : > { %v763_v8 = vld [vmem:[%s1146_s21 + $0x1] ss:$2 sm:$0xf]  ;;  %v1179_v15 = vld [vmem:[%s253_s18 + $0x8] sm:$0xff]  ;;  %v1182_v17 = vld [vmem:[%s253_s18 + $0x10] sm:$0xff]  ;;  %s762_s24 = sshll.u32 %s1142_s7, 7 }
  0x5a   : > { %v309_v1 = vshrl.u32 %v308_v0, 7  ;;  %v1174_v12 = vld [vmem:[%s1153_s30] sm:$0xff]  ;;  %v1188_v20 = vld [vmem:[%s1153_s30 + $0x8] sm:$0xff]  ;;  %v1190_v21 = vld [vmem:[%s253_s18 + $0x18] sm:$0xff]  ;;  %s1222_s6 = scalar_lea.vmem [#allocation8], %s762_s24  ;;  %s591_s9 = scalar_lea.sflag [#allocation4], %s1142_s7 }
  0x5b   : > { %v1176_v13 = vld [vmem:[%s253_s18] sm:$0xff]  ;;  %v764_v22 = vld [vmem:[%s1146_s21 + $0x8] ss:$2 sm:$0xf]  ;;  %v1196_v25 = vld [vmem:[%s1153_s30 + $0x10] sm:$0xff] }
  0x5c   : > { %v1159_v2 = vsub.s32 0, %v309_v1  ;;  %v1161_v3 = vsub.s32 1, %v309_v1  ;;  %v1163_v4 = vsub.s32 2, %v309_v1  ;;  %v1165_v5 = vsub.s32 3, %v309_v1  ;;  %v1200_v27 = vld [vmem:[%s1153_s30 + $0x18] sm:$0xff] }
  0x5d   : > { %v765_v29 = vld [vmem:[%s1146_s21 + $0x9] ss:$2 sm:$0xf]  ;;  %v770_v42 = vld [vmem:[%s1146_s21 + $0x10] ss:$2 sm:$0xf] }
  0x5e   : > { %v311_v7 = vrot.slane %v306_v6, %v1159_v2  ;;  %v315_v9 = vrot.slane %v306_v6, %v1161_v3  ;;  %v319_v10 = vrot.slane %v306_v6, %v1163_v4  ;;  %v323_v11 = vrot.slane %v306_v6, %v1165_v5  ;;  %v771_v43 = vld [vmem:[%s1146_s21 + $0x11] ss:$2 sm:$0xf]  ;;  %v776_v60 = vld [vmem:[%s1146_s21 + $0x18] ss:$2 sm:$0xf] }
  0x5f   : > { %v334_v14 = vrot.slane %v763_v8, %v1159_v2  ;;  %v338_v16 = vrot.slane %v763_v8, %v1161_v3  ;;  %v342_v18 = vrot.slane %v763_v8, %v1163_v4  ;;  %v346_v19 = vrot.slane %v763_v8, %v1165_v5  ;;  %v777_v1 = vld [vmem:[%s1146_s21 + $0x19] ss:$2 sm:$0xf] }
  0x60   : > { %v385_v34 = vrot.slane %v764_v22, %v1159_v2  ;;  %v408_v35 = vrot.slane %v765_v29, %v1159_v2  ;;  %v389_v36 = vrot.slane %v764_v22, %v1161_v3  ;;  %v412_v37 = vrot.slane %v765_v29, %v1161_v3 }
  0x61   : > { %v352_v23 = vsel %vm351_vm0, %v311_v7, %v334_v14  ;;  %v353_v24 = vsel %vm351_vm0, %v315_v9, %v338_v16  ;;  %v354_v26 = vsel %vm351_vm0, %v319_v10, %v342_v18  ;;  %v355_v28 = vsel %vm351_vm0, %v323_v11, %v346_v19 }
  0x62   : > { %v356_v30 = vadd.f32 %v352_v23, %v1176_v13  ;;  %v357_v31 = vadd.f32 %v353_v24, %v1179_v15  ;;  %v358_v32 = vadd.f32 %v354_v26, %v1182_v17  ;;  %v359_v33 = vadd.f32 %v355_v28, %v1190_v21 }
  0x63   : > { %v425_v44 = vsel %vm351_vm0, %v385_v34, %v408_v35  ;;  %v426_v45 = vsel %vm351_vm0, %v389_v36, %v412_v37  ;;  %v393_v46 = vrot.slane %v764_v22, %v1163_v4  ;;  %v416_v47 = vrot.slane %v765_v29, %v1163_v4 }
  0x64   : > { %v360_v38 = vmul.f32 %v356_v30, %v1174_v12  ;;  %v361_v39 = vmul.f32 %v357_v31, %v1188_v20  ;;  %v362_v40 = vmul.f32 %v358_v32, %v1196_v25  ;;  %v363_v41 = vmul.f32 %v359_v33, %v1200_v27 }
  0x65   : > { %v429_v48 = vadd.f32 %v425_v44, %v1176_v13  ;;  %v430_v49 = vadd.f32 %v426_v45, %v1179_v15  ;;  %v397_v50 = vrot.slane %v764_v22, %v1165_v5  ;;  %v420_v51 = vrot.slane %v765_v29, %v1165_v5 }
  0x66   : > { %367 = vst [vmem:[%s1222_s6] sm:$0xff] %v360_v38  ;;  %368 = vst [vmem:[%s1222_s6 + $0x8] sm:$0xff] %v361_v39  ;;  %v427_v52 = vsel %vm351_vm0, %v393_v46, %v416_v47  ;;  %v458_v53 = vrot.slane %v770_v42, %v1159_v2  ;;  %v481_v54 = vrot.slane %v771_v43, %v1159_v2 }
  0x67   : > { %369 = vst [vmem:[%s1222_s6 + $0x10] sm:$0xff] %v362_v40  ;;  %370 = vst [vmem:[%s1222_s6 + $0x18] sm:$0xff] %v363_v41  ;;  %v462_v55 = vrot.slane %v770_v42, %v1161_v3  ;;  %v433_v56 = vmul.f32 %v429_v48, %v1174_v12  ;;  %v434_v57 = vmul.f32 %v430_v49, %v1188_v20 }
  0x68   : > { %v431_v58 = vadd.f32 %v427_v52, %v1182_v17  ;;  %v428_v59 = vsel %vm351_vm0, %v397_v50, %v420_v51  ;;  %v498_v62 = vsel %vm351_vm0, %v458_v53, %v481_v54  ;;  %v485_v63 = vrot.slane %v771_v43, %v1161_v3 }
  0x69   : > { %v432_v61 = vadd.f32 %v428_v59, %v1190_v21  ;;  %v466_v0 = vrot.slane %v770_v42, %v1163_v4  ;;  %766 = vst [vmem:[%s1222_s6 + $0x20] sm:$0xff] %v433_v56  ;;  %767 = vst [vmem:[%s1222_s6 + $0x28] sm:$0xff] %v434_v57  ;;  %v502_v7 = vadd.f32 %v498_v62, %v1176_v13 }
  0x6a   : > { %v435_v6 = vmul.f32 %v431_v58, %v1196_v25  ;;  %v489_v8 = vrot.slane %v771_v43, %v1163_v4  ;;  %v470_v9 = vrot.slane %v770_v42, %v1165_v5  ;;  %v499_v11 = vsel %vm351_vm0, %v462_v55, %v485_v63 }
  0x6b   : > { %v436_v10 = vmul.f32 %v432_v61, %v1200_v27  ;;  %v493_v14 = vrot.slane %v771_v43, %v1165_v5  ;;  %v531_v16 = vrot.slane %v776_v60, %v1159_v2  ;;  %v506_v18 = vmul.f32 %v502_v7, %v1174_v12 }
  0x6c   : > { %768 = vst [vmem:[%s1222_s6 + $0x30] sm:$0xff] %v435_v6  ;;  %v503_v19 = vadd.f32 %v499_v11, %v1179_v15  ;;  %v500_v22 = vsel %vm351_vm0, %v466_v0, %v489_v8  ;;  %v554_v23 = vrot.slane %v777_v1, %v1159_v2  ;;  %v535_v28 = vrot.slane %v776_v60, %v1161_v3 }
  0x6d   : > { %769 = vst [vmem:[%s1222_s6 + $0x38] sm:$0xff] %v436_v10  ;;  %v504_v24 = vadd.f32 %v500_v22, %v1182_v17  ;;  %v501_v26 = vsel %vm351_vm0, %v470_v9, %v493_v14  ;;  %v558_v29 = vrot.slane %v777_v1, %v1161_v3  ;;  %772 = vst [vmem:[%s1222_s6 + $0x40] sm:$0xff] %v506_v18 }
  0x6e   : > { %v507_v30 = vmul.f32 %v503_v19, %v1188_v20  ;;  %v505_v31 = vadd.f32 %v501_v26, %v1190_v21  ;;  %v571_v32 = vsel %vm351_vm0, %v531_v16, %v554_v23  ;;  %v539_v2 = vrot.slane %v776_v60, %v1163_v4 }
  0x6f   : > { %v508_v33 = vmul.f32 %v504_v24, %v1196_v25  ;;  %v575_v34 = vadd.f32 %v571_v32, %v1176_v13  ;;  %v572_v35 = vsel %vm351_vm0, %v535_v28, %v558_v29  ;;  %v562_v3 = vrot.slane %v777_v1, %v1163_v4 }
  0x70   : > { %773 = vst [vmem:[%s1222_s6 + $0x48] sm:$0xff] %v507_v30  ;;  %v509_v36 = vmul.f32 %v505_v31, %v1200_v27  ;;  %v576_v37 = vadd.f32 %v572_v35, %v1179_v15  ;;  %v543_v38 = vrot.slane %v776_v60, %v1165_v5  ;;  %v566_v39 = vrot.slane %v777_v1, %v1165_v5 }
  0x71   : > { %774 = vst [vmem:[%s1222_s6 + $0x50] sm:$0xff] %v508_v33  ;;  %v579_v13 = vmul.f32 %v575_v34, %v1174_v12  ;;  %v573_v40 = vsel %vm351_vm0, %v539_v2, %v562_v3 }
  0x72   : > { %775 = vst [vmem:[%s1222_s6 + $0x58] sm:$0xff] %v509_v36  ;;  %v580_v4 = vmul.f32 %v576_v37, %v1188_v20  ;;  %v577_v41 = vadd.f32 %v573_v40, %v1182_v17  ;;  %v574_v42 = vsel %vm351_vm0, %v543_v38, %v566_v39 }
  0x73   : > { %778 = vst [vmem:[%s1222_s6 + $0x60] sm:$0xff] %v579_v13  ;;  %v578_v15 = vadd.f32 %v574_v42, %v1190_v21  ;;  %597 = sbr.rel (!%p1097_p9) target bundleno = 144 (0x90), region = 48 }
  0x74   : > { %779 = vst [vmem:[%s1222_s6 + $0x68] sm:$0xff] %v580_v4  ;;  %v581_v43 = vmul.f32 %v577_v41, %v1196_v25 }
  0x75   : > { %v582_v5 = vmul.f32 %v578_v15, %v1200_v27 }
  0x76   : > { %780 = vst [vmem:[%s1222_s6 + $0x70] sm:$0xff] %v581_v43 }
  0x77   : > { %781 = vst [vmem:[%s1222_s6 + $0x78] sm:$0xff] %v582_v5 }
  0x78   : > { %605 = vsyncadd %s591_s9, 1536  ;;  %s790_s0 = sshll.u32 %s1002_s15, 9  ;;  %s612_s23 = sshll.u32 %s1222_s6, 4  ;;  %s613_s23 = int_to_ptr.vmem [resolvable:$true] %s612_s23 }
  0x79   : > { %s610_s4 = scalar_lea.hbm %s1338_s3, %s790_s0  ;;  %s930_s5 = scalar_lea.vmem %s613_s23, 512 }
  0x7a   : > { %p931_p4 = scmp.ne.s32.totalorder %s613_s23, %s930_s5  ;;  %s1018_s26 = smov [#allocation8]  }
  0x7b   : > { %s932_s11 = sshll.u32 %s1018_s26, 4  ;;  %s933_s11 = int_to_ptr.vmem [resolvable:$false] %s932_s11 }
  0x7c   : > { %s934_s19 = scalar_lea.vmem %s933_s11, 4096  ;;  %p935_p8 = scmp.lt.s32.totalorder %s613_s23, %s933_s11 }
  0x7d   : > { %p936_p9 = scmp.lt.s32.totalorder %s934_s19, %s930_s5 }
  0x7f   : > { %p937_p3 = por %p936_p9, %p935_p8 }
  0x81   : > { %p938_p5 = pnand %p937_p3, %p931_p4 }
  0x83   : > { %941 = shalt.err (!%p938_p5)
}
  0x84   : > { %s942_s25 = scalar_lea.hbm %s610_s4, 512  ;;  %s944_s10 = scalar_lea.hbm %s1338_s3, 1024 }
  0x85   : > { %p943_p6 = scmp.ne.s32.totalorder %s610_s4, %s942_s25  ;;  %p945_p7 = scmp.lt.s32.totalorder %s610_s4, %s1338_s3 }
  0x86   : > { %p946_p10 = scmp.lt.s32.totalorder %s944_s10, %s942_s25 }
  0x88   : > { %p947_p13 = por %p946_p10, %p945_p7 }
  0x8a   : > { %p948_p0 = pnand %p947_p13, %p943_p6 }
  0x8c   : > { %951 = shalt.err (!%p948_p0)
}
  0x8d   : > { %s1019_s22 = smov 512   ;;  %s1020_s30 = smov 1024  }
  0x8e   : > { %s1021_s18 = smov 32  }
  0x8f   : > { %618 = dma.vmem_to_hbm [thread:$0]  %s613_s23, 512, %s610_s4, %s591_s9, %s1019_s22, %s1020_s30, %s1021_s18  }
  0x90 PF: > { %s627_s24 = sand.u32 1, %s990_s12   ;;  %p798_p1 = pnand %p748_p12, %p1104_p11 }
  0x91   : > { %s628_s6 = scalar_lea.sflag [#allocation4], %s627_s24 }
  0x92   : > { %p799_p2 = pneg %p798_p1 }
  0x94   : > { %985 = dma.done.wait (%p799_p2), %s628_s6, 2048  }
  0x95   : > { %987 = vsyncadd (%p799_p2), %s628_s6, 4294965248  ;;  %s22_s17 = sadd.s32 1, %s1010_s17   ;;  %s1348_s7 = sld [smem:[#allocation13_spill]] }
  0x96   : > { %p19_p4 = scmp.ge.s32.totalorder %s22_s17, 4   ;;  %s1349_s9 = sld [smem:[#allocation12_spill]] }
  0x97   : > { %s1350_s12 = smov %s994_s13  ;;  %s1351_s13 = smov %s998_s14 }
  0x98   : > { %s1353_s15 = smov %s1006_s16  ;;  %21 = sbr.rel (!%p19_p4) target bundleno = 10 (0xa), region = 112 }
  0x9b   : > { %s1352_s14 = smov %s1348_s7 }
  0x9c   : > { %s1354_s16 = smov %s1349_s9 }
  0x9d   :  { %633 = vsyncpa [#allocation3], 1 }
  0x9e   :  { %635 = vsyncpa [#allocation3 + $0x1], 1 }
  0x9f   :  { %636 = vsyncpa [#allocation6], 1 }
  0xa0   :  { %638 = vsyncpa [#allocation6 + $0x1], 1 }
  0xa1   :  { %639 = vsyncpa [#allocation4], 1 }
  0xa2   :  { %641 = vsyncpa [#allocation4 + $0x1], 1 }

</bundles_post_ra>
